<compile_context>
chip_gen: v7x
topology: tpu7x:2x2x1
jax: 0.10.0
libtpu: 0.0.40
codegen_flags: <defaults>
</compile_context>

<pallas_src>
import jax
import jax.numpy as jnp
from jax.experimental import pallas as pl
from jax.experimental.pallas import tpu as pltpu

# ---------------- model dimensions ----------------
LATENT_DIM = 2
OUT_H, OUT_W = 16, 16                  # config.output_dim
INPUT_DIM = OUT_H * OUT_W              # config.input_dim  (= 256)
OUT_DIM = OUT_H * OUT_W                # decoder output    (= 256)
H1 = 128                               # fc1 / fc4 width
H2 = 64                                # fc2 / fc3 width

BATCH = 256                            # per-call batch (demo size)
TILE_B = 64                            # batch rows per grid step -> grid=(4,)
                                       # (>=2 steps per v7x TensorCore)

WEIGHT_DTYPE = jnp.bfloat16            # packed-parameter / x storage dtype


def _ru16(n):                          # round up to 16 rows (bf16 sublane tile)
    return (n + 15) // 16 * 16


# ---------------- packed-parameter layout (static row offsets) ----------------
# 128-column group: w1 (256,128), b1, w4 (64,128), b4
W1_OFF = 0
B1_OFF = W1_OFF + _ru16(INPUT_DIM)         # 256
W4_OFF = B1_OFF + 16                       # 272
B4_OFF = W4_OFF + _ru16(H2)                # 336
PK128_ROWS = B4_OFF + 16                   # 352

# 64-column group: w2 (128,64), b2, [wm|wl] (64,4 -> padded to 64), [bm|bl],
#                  w3 (2,64), b3
W2_OFF = 0
B2_OFF = W2_OFF + _ru16(H1)                # 128
WML_OFF = B2_OFF + 16                      # 144
BML_OFF = WML_OFF + _ru16(H2)              # 208
W3_OFF = BML_OFF + 16                      # 224
B3_OFF = W3_OFF + _ru16(LATENT_DIM)        # 240
PK64_ROWS = B3_OFF + 16                    # 256

# 256-column group: w5 (128,256), b5
W5_OFF = 0
B5_OFF = W5_OFF + _ru16(H1)                # 128
PK256_ROWS = B5_OFF + 16                   # 144


# ---------------- kernel ----------------
def _vae_kernel(x_ref, eps_ref, pk128_ref, pk64_ref, pk256_ref,
                recon_ref, stats_ref):
    f32 = jnp.float32
    bf16 = jnp.bfloat16

    xb = x_ref[...]                                     # (TB, 256), already bf16

    # ---- encode ----
    # fc1: (TB,256) @ (256,128)
    w1 = pk128_ref[W1_OFF:W1_OFF + INPUT_DIM, :]
    b1 = pk128_ref[B1_OFF:B1_OFF + 1, :].astype(f32)
    h = jnp.dot(xb, w1, preferred_element_type=f32) + b1
    h = jnp.maximum(h, 0.0)

    # fc2: (TB,128) @ (128,64)
    w2 = pk64_ref[W2_OFF:W2_OFF + H1, :]
    b2 = pk64_ref[B2_OFF:B2_OFF + 1, :].astype(f32)
    h = jnp.dot(h.astype(bf16), w2, preferred_element_type=f32) + b2
    h = jnp.maximum(h, 0.0)

    # fused mean|logvar head: one matmul instead of two N=2 matmuls.
    # wml is stored 64 columns wide; only cols [0, 2*LATENT_DIM) are real
    # (rest are zeros).
    wml = pk64_ref[WML_OFF:WML_OFF + H2, :]
    bml = pk64_ref[BML_OFF:BML_OFF + 1, :].astype(f32)
    stats = jnp.dot(h.astype(bf16), wml, preferred_element_type=f32) + bml
    mean = stats[:, :LATENT_DIM]
    logvar = stats[:, LATENT_DIM:2 * LATENT_DIM]
    # Lane-dense writeback: store the full 64-wide slab (unmasked vst);
    # mean/logvar are sliced outside the kernel.
    stats_ref[...] = stats

    # ---- reparameterize: z = mean + eps * exp(0.5 * logvar) ----
    z = mean + eps_ref[...] * jnp.exp(0.5 * logvar)                 # (TB, 2)

    # ---- decode ----
    # fc3 (K = 2): rank-1 broadcast-FMAs on the VPU, no MXU round-trip.
    w3 = pk64_ref[W3_OFF:W3_OFF + LATENT_DIM, :].astype(f32)        # (2, 64)
    b3 = pk64_ref[B3_OFF:B3_OFF + 1, :].astype(f32)                 # (1, 64)
    d = b3
    for j in range(LATENT_DIM):
        d = d + z[:, j:j + 1] * w3[j:j + 1, :]
    d = jnp.maximum(d, 0.0)

    # fc4: (TB,64) @ (64,128)
    w4 = pk128_ref[W4_OFF:W4_OFF + H2, :]
    b4 = pk128_ref[B4_OFF:B4_OFF + 1, :].astype(f32)
    d = jnp.dot(d.astype(bf16), w4, preferred_element_type=f32) + b4
    d = jnp.maximum(d, 0.0)

    # fc5 + sigmoid: (TB,128) @ (128,256)
    w5 = pk256_ref[W5_OFF:W5_OFF + H1, :]
    b5 = pk256_ref[B5_OFF:B5_OFF + 1, :].astype(f32)
    logits = jnp.dot(d.astype(bf16), w5, preferred_element_type=f32) + b5
    recon_ref[...] = jax.nn.sigmoid(logits)


# ---------------- host-side parameter packing ----------------
def pack_params(params, dtype=WEIGHT_DTYPE):
    """params: [(w1,b1),(w2,b2),(wm,bm),(wl,bl),(w3,b3),(w4,b4),(w5,b5)]
    with weights stored transposed as (fan_in, fan_out).
    Returns (pk128, pk64, pk256) column-grouped arrays in `dtype`."""
    (w1, b1), (w2, b2), (wm, bm), (wl, bl), (w3, b3), (w4, b4), (w5, b5) = params

    def place(group, arr, row_off):
        r, c = arr.shape
        return group.at[row_off:row_off + r, :c].set(arr)

    pk128 = jnp.zeros((PK128_ROWS, H1), jnp.float32)
    pk128 = place(pk128, w1, W1_OFF)
    pk128 = place(pk128, b1, B1_OFF)
    pk128 = place(pk128, w4, W4_OFF)
    pk128 = place(pk128, b4, B4_OFF)

    pk64 = jnp.zeros((PK64_ROWS, H2), jnp.float32)
    pk64 = place(pk64, w2, W2_OFF)
    pk64 = place(pk64, b2, B2_OFF)
    pk64 = place(pk64, jnp.concatenate([wm, wl], axis=1), WML_OFF)   # fused head
    pk64 = place(pk64, jnp.concatenate([bm, bl], axis=1), BML_OFF)
    pk64 = place(pk64, w3, W3_OFF)
    pk64 = place(pk64, b3, B3_OFF)

    pk256 = jnp.zeros((PK256_ROWS, OUT_DIM), jnp.float32)
    pk256 = place(pk256, w5, W5_OFF)
    pk256 = place(pk256, b5, B5_OFF)

    return pk128.astype(dtype), pk64.astype(dtype), pk256.astype(dtype)


# ---------------- wrapper ----------------
def vae_forward(x, eps, packed, *, tile_b=TILE_B):
    """x: (B, INPUT_DIM) bf16 (or f32, cast on entry), eps: (B, LATENT_DIM) f32,
    packed: pack_params(...).
    Returns (recon (B, OUT_DIM), mean (B, LATENT_DIM), logvar (B, LATENT_DIM))."""
    pk128, pk64, pk256 = packed
    if x.dtype != WEIGHT_DTYPE:
        # Numerically identical to the old in-kernel cast; doing it here keeps
        # the kernel's dominant input DMA at bf16 width.
        x = x.astype(WEIGHT_DTYPE)
    B = x.shape[0]
    tile_b = min(tile_b, B)
    assert B % tile_b == 0, "batch must be a multiple of the batch tile"
    grid = (B // tile_b,)

    def batch_spec(ncols):
        return pl.BlockSpec((tile_b, ncols), lambda i: (i, 0))

    def param_spec(shape):
        # Constant block index -> packed params stay resident in VMEM
        # across all batch tiles (loaded once).
        return pl.BlockSpec(shape, lambda i: (0, 0))

    out_shapes = (
        jax.ShapeDtypeStruct((B, OUT_DIM), jnp.float32),
        jax.ShapeDtypeStruct((B, H2), jnp.float32),   # lane-dense [mean|logvar|0...] slab
    )

    recon, stats = pl.pallas_call(
        _vae_kernel,
        out_shape=out_shapes,
        grid=grid,
        in_specs=[
            batch_spec(INPUT_DIM),
            batch_spec(LATENT_DIM),
            param_spec(pk128.shape),
            param_spec(pk64.shape),
            param_spec(pk256.shape),
        ],
        out_specs=(batch_spec(OUT_DIM), batch_spec(H2)),
        compiler_params=pltpu.CompilerParams(
            dimension_semantics=("parallel",)),   # v7x: both TCs split the batch
    )(x, eps, pk128, pk64, pk256)

    mean = stats[:, :LATENT_DIM]
    logvar = stats[:, LATENT_DIM:2 * LATENT_DIM]
    return recon, mean, logvar


# ---------------- init & reference ----------------
def init_linear(key, fan_in, fan_out):
    """Matches torch.nn.Linear default init (U(-k, k), k = 1/sqrt(fan_in)).
    Weight stored transposed as (fan_in, fan_out) so the kernel does x @ W."""
    kw, kb = jax.random.split(key)
    bound = 1.0 / (fan_in ** 0.5)
    w = jax.random.uniform(kw, (fan_in, fan_out), jnp.float32, -bound, bound)
    b = jax.random.uniform(kb, (1, fan_out), jnp.float32, -bound, bound)
    return (w, b)


def ref_forward(x, eps, params, dtype=WEIGHT_DTYPE):
    """Pure-JAX reference mirroring the kernel's precision (bf16 matmul inputs,
    f32 accumulation, f32 elementwise chain)."""
    (w1, b1), (w2, b2), (wm, bm), (wl, bl), (w3, b3), (w4, b4), (w5, b5) = params
    q = lambda a: a.astype(dtype)

    def lin(h, w, b):
        return (jnp.dot(q(h), q(w), preferred_element_type=jnp.float32)
                + q(b).astype(jnp.float32))

    h = jax.nn.relu(lin(x, w1, b1))
    h = jax.nn.relu(lin(h, w2, b2))
    mean = lin(h, wm, bm)
    logvar = lin(h, wl, bl)
    z = mean + eps * jnp.exp(0.5 * logvar)
    w3f = q(w3).astype(jnp.float32)
    b3f = q(b3).astype(jnp.float32)
    d = jax.nn.relu(z @ w3f + b3f)                 # mirrors the f32 rank-1 path
    d = jax.nn.relu(lin(d, w4, b4))
    return jax.nn.sigmoid(lin(d, w5, b5)), mean, logvar


if __name__ == "__main__":
    key = jax.random.PRNGKey(0)
    keys = jax.random.split(key, 9)

    params = [
        init_linear(keys[0], INPUT_DIM, H1),          # fc1
        init_linear(keys[1], H1, H2),                 # fc2
        init_linear(keys[2], H2, LATENT_DIM),         # fc_mean
        init_linear(keys[3], H2, LATENT_DIM),         # fc_logvar
        init_linear(keys[4], LATENT_DIM, H2),         # fc3
        init_linear(keys[5], H2, H1),                 # fc4
        init_linear(keys[6], H1, OUT_DIM),            # fc5
    ]
    packed = pack_params(params)

    # Synthetic image batch (values in [0,1)); flattened like x.view(-1, input_dim).
    x_img = jax.random.uniform(keys[7], (BATCH, OUT_H, OUT_W), jnp.float32)
    x_f32 = x_img.reshape(BATCH, INPUT_DIM)
    x = x_f32.astype(WEIGHT_DTYPE)                    # bf16 input (halves x DMA)
    # eps ~ N(0,1), stands in for torch.randn_like(std).
    eps = jax.random.normal(keys[8], (BATCH, LATENT_DIM), jnp.float32)

    recon, mean, logvar = vae_forward(x, eps, packed)
    jax.block_until_ready((recon, mean, logvar))

    # Correctness check against the pure-JAX reference (same bf16 rounding).
    r_ref, m_ref, lv_ref = ref_forward(x_f32, eps, params)
    assert recon.shape == (BATCH, OUT_DIM)
    assert mean.shape == (BATCH, LATENT_DIM) and logvar.shape == (BATCH, LATENT_DIM)
    assert jnp.allclose(recon, r_ref, atol=5e-3, rtol=5e-3), \
        f"recon mismatch: {jnp.max(jnp.abs(recon - r_ref))}"
    assert jnp.allclose(mean, m_ref, atol=5e-3, rtol=5e-3), \
        f"mean mismatch: {jnp.max(jnp.abs(mean - m_ref))}"
    assert jnp.allclose(logvar, lv_ref, atol=5e-3, rtol=5e-3), \
        f"logvar mismatch: {jnp.max(jnp.abs(logvar - lv_ref))}"

    print("KERNEL_OK")
</pallas_src>

<mosaic_0001>
module attributes {stable_mosaic.version = 11 : i64} {
  func.func @_vae_kernel(%arg0: i32, %arg1: memref<64x256xbf16, #tpu.memory_space<vmem>>, %arg2: memref<64x2xf32, #tpu.memory_space<vmem>>, %arg3: memref<352x128xbf16, #tpu.memory_space<vmem>>, %arg4: memref<256x64xbf16, #tpu.memory_space<vmem>>, %arg5: memref<144x256xbf16, #tpu.memory_space<vmem>>, %arg6: memref<64x256xf32, #tpu.memory_space<vmem>>, %arg7: memref<64x64xf32, #tpu.memory_space<vmem>>) attributes {dimension_semantics = [#tpu.dimension_semantics<parallel>], iteration_bounds = array<i64: 4>, scalar_prefetch = 0 : i64, scratch_operands = 0 : i64, tpu.core_type = #tpu.core_type<tc>, window_params = [{transform_indices = @transform_0, window_bounds = array<i64: 64, 256>}, {transform_indices = @transform_1, window_bounds = array<i64: 64, 2>}, {pipeline_mode = #tpu.pipeline_mode<synchronous>, transform_indices = @transform_2, window_bounds = array<i64: 352, 128>}, {pipeline_mode = #tpu.pipeline_mode<synchronous>, transform_indices = @transform_3, window_bounds = array<i64: 256, 64>}, {pipeline_mode = #tpu.pipeline_mode<synchronous>, transform_indices = @transform_4, window_bounds = array<i64: 144, 256>}, {transform_indices = @transform_5, window_bounds = array<i64: 64, 256>}, {transform_indices = @transform_6, window_bounds = array<i64: 64, 64>}]} {
    %c0 = arith.constant 0 : index
    %c0_0 = arith.constant 0 : index
    %0 = vector.load %arg1[%c0, %c0_0] : memref<64x256xbf16, #tpu.memory_space<vmem>>, vector<64x256xbf16>
    %c0_1 = arith.constant 0 : index
    %c0_2 = arith.constant 0 : index
    %1 = vector.load %arg3[%c0_1, %c0_2] : memref<352x128xbf16, #tpu.memory_space<vmem>>, vector<256x128xbf16>
    %c256 = arith.constant 256 : index
    %c0_3 = arith.constant 0 : index
    %2 = vector.load %arg3[%c256, %c0_3] : memref<352x128xbf16, #tpu.memory_space<vmem>>, vector<1x128xbf16>
    %3 = arith.extf %2 : vector<1x128xbf16> to vector<1x128xf32>
    %cst = arith.constant dense<0.000000e+00> : vector<64x128xf32>
    %4 = tpu.matmul %0, %1, %cst {dimension_numbers = #tpu.dot_dimension_numbers<[1], [0], [0], [1], [0, 0, 1, 1], [], []>} : vector<64x256xbf16>, vector<256x128xbf16>, vector<64x128xf32> -> vector<64x128xf32>
    %5 = vector.broadcast %3 : vector<1x128xf32> to vector<64x128xf32>
    %6 = arith.addf %4, %5 : vector<64x128xf32>
    %cst_4 = arith.constant 0.000000e+00 : f32
    %7 = vector.broadcast %cst_4 : f32 to vector<64x128xf32>
    %8 = arith.maximumf %6, %7 : vector<64x128xf32>
    %c0_5 = arith.constant 0 : index
    %c0_6 = arith.constant 0 : index
    %9 = vector.load %arg4[%c0_5, %c0_6] : memref<256x64xbf16, #tpu.memory_space<vmem>>, vector<128x64xbf16>
    %c128 = arith.constant 128 : index
    %c0_7 = arith.constant 0 : index
    %10 = vector.load %arg4[%c128, %c0_7] : memref<256x64xbf16, #tpu.memory_space<vmem>>, vector<1x64xbf16>
    %11 = arith.extf %10 : vector<1x64xbf16> to vector<1x64xf32>
    %12 = arith.truncf %8 : vector<64x128xf32> to vector<64x128xbf16>
    %cst_8 = arith.constant dense<0.000000e+00> : vector<64x64xf32>
    %13 = tpu.matmul %12, %9, %cst_8 {dimension_numbers = #tpu.dot_dimension_numbers<[1], [0], [0], [1], [0, 0, 1, 1], [], []>} : vector<64x128xbf16>, vector<128x64xbf16>, vector<64x64xf32> -> vector<64x64xf32>
    %14 = vector.broadcast %11 : vector<1x64xf32> to vector<64x64xf32>
    %15 = arith.addf %13, %14 : vector<64x64xf32>
    %cst_9 = arith.constant 0.000000e+00 : f32
    %16 = vector.broadcast %cst_9 : f32 to vector<64x64xf32>
    %17 = arith.maximumf %15, %16 : vector<64x64xf32>
    %c144 = arith.constant 144 : index
    %c0_10 = arith.constant 0 : index
    %18 = vector.load %arg4[%c144, %c0_10] : memref<256x64xbf16, #tpu.memory_space<vmem>>, vector<64x64xbf16>
    %c208 = arith.constant 208 : index
    %c0_11 = arith.constant 0 : index
    %19 = vector.load %arg4[%c208, %c0_11] : memref<256x64xbf16, #tpu.memory_space<vmem>>, vector<1x64xbf16>
    %20 = arith.extf %19 : vector<1x64xbf16> to vector<1x64xf32>
    %21 = arith.truncf %17 : vector<64x64xf32> to vector<64x64xbf16>
    %cst_12 = arith.constant dense<0.000000e+00> : vector<64x64xf32>
    %22 = tpu.matmul %21, %18, %cst_12 {dimension_numbers = #tpu.dot_dimension_numbers<[1], [0], [0], [1], [0, 0, 1, 1], [], []>} : vector<64x64xbf16>, vector<64x64xbf16>, vector<64x64xf32> -> vector<64x64xf32>
    %23 = vector.broadcast %20 : vector<1x64xf32> to vector<64x64xf32>
    %24 = arith.addf %22, %23 : vector<64x64xf32>
    %25 = vector.extract_strided_slice %24 {offsets = [0, 0], sizes = [64, 2], strides = [1, 1]} : vector<64x64xf32> to vector<64x2xf32>
    %26 = vector.extract_strided_slice %24 {offsets = [0, 2], sizes = [64, 2], strides = [1, 1]} : vector<64x64xf32> to vector<64x2xf32>
    %c0_13 = arith.constant 0 : index
    %c0_14 = arith.constant 0 : index
    %27 = vector.load %arg7[%c0_13, %c0_14] : memref<64x64xf32, #tpu.memory_space<vmem>>, vector<64x64xf32>
    tpu.vector_store %arg7[%c0_13, %c0_14], %24 {strides = array<i32>} : memref<64x64xf32, #tpu.memory_space<vmem>>, vector<64x64xf32>,
    %c0_15 = arith.constant 0 : index
    %c0_16 = arith.constant 0 : index
    %28 = vector.load %arg2[%c0_15, %c0_16] : memref<64x2xf32, #tpu.memory_space<vmem>>, vector<64x2xf32>
    %cst_17 = arith.constant 5.000000e-01 : f32
    %29 = vector.broadcast %cst_17 : f32 to vector<64x2xf32>
    %30 = arith.mulf %29, %26 : vector<64x2xf32>
    %31 = math.exp %30 : vector<64x2xf32>
    %32 = arith.mulf %28, %31 : vector<64x2xf32>
    %33 = arith.addf %25, %32 : vector<64x2xf32>
    %c224 = arith.constant 224 : index
    %c0_18 = arith.constant 0 : index
    %34 = vector.load %arg4[%c224, %c0_18] : memref<256x64xbf16, #tpu.memory_space<vmem>>, vector<2x64xbf16>
    %35 = arith.extf %34 : vector<2x64xbf16> to vector<2x64xf32>
    %c240 = arith.constant 240 : index
    %c0_19 = arith.constant 0 : index
    %36 = vector.load %arg4[%c240, %c0_19] : memref<256x64xbf16, #tpu.memory_space<vmem>>, vector<1x64xbf16>
    %37 = arith.extf %36 : vector<1x64xbf16> to vector<1x64xf32>
    %38 = vector.extract_strided_slice %33 {offsets = [0, 0], sizes = [64, 1], strides = [1, 1]} : vector<64x2xf32> to vector<64x1xf32>
    %39 = vector.extract_strided_slice %35 {offsets = [0, 0], sizes = [1, 64], strides = [1, 1]} : vector<2x64xf32> to vector<1x64xf32>
    %40 = vector.broadcast %38 : vector<64x1xf32> to vector<64x64xf32>
    %41 = vector.broadcast %39 : vector<1x64xf32> to vector<64x64xf32>
    %42 = arith.mulf %40, %41 : vector<64x64xf32>
    %43 = vector.broadcast %37 : vector<1x64xf32> to vector<64x64xf32>
    %44 = arith.addf %43, %42 : vector<64x64xf32>
    %45 = vector.extract_strided_slice %33 {offsets = [0, 1], sizes = [64, 1], strides = [1, 1]} : vector<64x2xf32> to vector<64x1xf32>
    %46 = vector.extract_strided_slice %35 {offsets = [1, 0], sizes = [1, 64], strides = [1, 1]} : vector<2x64xf32> to vector<1x64xf32>
    %47 = vector.broadcast %45 : vector<64x1xf32> to vector<64x64xf32>
    %48 = vector.broadcast %46 : vector<1x64xf32> to vector<64x64xf32>
    %49 = arith.mulf %47, %48 : vector<64x64xf32>
    %50 = arith.addf %44, %49 : vector<64x64xf32>
    %cst_20 = arith.constant 0.000000e+00 : f32
    %51 = vector.broadcast %cst_20 : f32 to vector<64x64xf32>
    %52 = arith.maximumf %50, %51 : vector<64x64xf32>
    %c272 = arith.constant 272 : index
    %c0_21 = arith.constant 0 : index
    %53 = vector.load %arg3[%c272, %c0_21] : memref<352x128xbf16, #tpu.memory_space<vmem>>, vector<64x128xbf16>
    %c336 = arith.constant 336 : index
    %c0_22 = arith.constant 0 : index
    %54 = vector.load %arg3[%c336, %c0_22] : memref<352x128xbf16, #tpu.memory_space<vmem>>, vector<1x128xbf16>
    %55 = arith.extf %54 : vector<1x128xbf16> to vector<1x128xf32>
    %56 = arith.truncf %52 : vector<64x64xf32> to vector<64x64xbf16>
    %cst_23 = arith.constant dense<0.000000e+00> : vector<64x128xf32>
    %57 = tpu.matmul %56, %53, %cst_23 {dimension_numbers = #tpu.dot_dimension_numbers<[1], [0], [0], [1], [0, 0, 1, 1], [], []>} : vector<64x64xbf16>, vector<64x128xbf16>, vector<64x128xf32> -> vector<64x128xf32>
    %58 = vector.broadcast %55 : vector<1x128xf32> to vector<64x128xf32>
    %59 = arith.addf %57, %58 : vector<64x128xf32>
    %cst_24 = arith.constant 0.000000e+00 : f32
    %60 = vector.broadcast %cst_24 : f32 to vector<64x128xf32>
    %61 = arith.maximumf %59, %60 : vector<64x128xf32>
    %c0_25 = arith.constant 0 : index
    %c0_26 = arith.constant 0 : index
    %62 = vector.load %arg5[%c0_25, %c0_26] : memref<144x256xbf16, #tpu.memory_space<vmem>>, vector<128x256xbf16>
    %c128_27 = arith.constant 128 : index
    %c0_28 = arith.constant 0 : index
    %63 = vector.load %arg5[%c128_27, %c0_28] : memref<144x256xbf16, #tpu.memory_space<vmem>>, vector<1x256xbf16>
    %64 = arith.extf %63 : vector<1x256xbf16> to vector<1x256xf32>
    %65 = arith.truncf %61 : vector<64x128xf32> to vector<64x128xbf16>
    %cst_29 = arith.constant dense<0.000000e+00> : vector<64x256xf32>
    %66 = tpu.matmul %65, %62, %cst_29 {dimension_numbers = #tpu.dot_dimension_numbers<[1], [0], [0], [1], [0, 0, 1, 1], [], []>} : vector<64x128xbf16>, vector<128x256xbf16>, vector<64x256xf32> -> vector<64x256xf32>
    %67 = vector.broadcast %64 : vector<1x256xf32> to vector<64x256xf32>
    %68 = arith.addf %66, %67 : vector<64x256xf32>
    %69 = arith.negf %68 : vector<64x256xf32>
    %70 = math.exp %69 : vector<64x256xf32>
    %cst_30 = arith.constant 1.000000e+00 : f32
    %71 = vector.broadcast %cst_30 : f32 to vector<64x256xf32>
    %72 = arith.addf %71, %70 : vector<64x256xf32>
    %73 = arith.divf %71, %72 : vector<64x256xf32>
    %c0_31 = arith.constant 0 : index
    %c0_32 = arith.constant 0 : index
    %74 = vector.load %arg6[%c0_31, %c0_32] : memref<64x256xf32, #tpu.memory_space<vmem>>, vector<64x256xf32>
    tpu.vector_store %arg6[%c0_31, %c0_32], %73 {strides = array<i32>} : memref<64x256xf32, #tpu.memory_space<vmem>>, vector<64x256xf32>,
    return
  }
  func.func @transform_0(%arg0: i32) -> (i32, i32) {
    %c0_i32 = arith.constant 0 : i32
    %c0_i32_0 = arith.constant 0 : i32
    return %arg0, %c0_i32 : i32, i32
  }
  func.func @transform_1(%arg0: i32) -> (i32, i32) {
    %c0_i32 = arith.constant 0 : i32
    %c0_i32_0 = arith.constant 0 : i32
    return %arg0, %c0_i32 : i32, i32
  }
  func.func @transform_2(%arg0: i32) -> (i32, i32) {
    %c0_i32 = arith.constant 0 : i32
    %c0_i32_0 = arith.constant 0 : i32
    %c0_i32_1 = arith.constant 0 : i32
    return %c0_i32, %c0_i32_0 : i32, i32
  }
  func.func @transform_3(%arg0: i32) -> (i32, i32) {
    %c0_i32 = arith.constant 0 : i32
    %c0_i32_0 = arith.constant 0 : i32
    %c0_i32_1 = arith.constant 0 : i32
    return %c0_i32, %c0_i32_0 : i32, i32
  }
  func.func @transform_4(%arg0: i32) -> (i32, i32) {
    %c0_i32 = arith.constant 0 : i32
    %c0_i32_0 = arith.constant 0 : i32
    %c0_i32_1 = arith.constant 0 : i32
    return %c0_i32, %c0_i32_0 : i32, i32
  }
  func.func @transform_5(%arg0: i32) -> (i32, i32) {
    %c0_i32 = arith.constant 0 : i32
    %c0_i32_0 = arith.constant 0 : i32
    return %arg0, %c0_i32 : i32, i32
  }
  func.func @transform_6(%arg0: i32) -> (i32, i32) {
    %c0_i32 = arith.constant 0 : i32
    %c0_i32_0 = arith.constant 0 : i32
    return %arg0, %c0_i32 : i32, i32
  }
}

</mosaic_0001>

<bundles_post_ra>
// kernel: tpu_custom_call.1
= control target key start
LH: loop header
LB: loop body
LE: loop exit
PB: predicated region body
PF: predicated region fallthrough
CT: control target
= control target key end

     0   :  { %12 = vsyncpa [#allocation3], 0  ;;  %s2608_s0 = inlined_call_operand.vmem [shape: bf16[256,256], index: 0, kind: input, shape index: {}]   ;;  %s2609_s1 = inlined_call_operand.vmem [shape: f32[256,2], index: 1, kind: input, shape index: {}]   ;;  %s2610_s2 = inlined_call_operand.vmem [shape: bf16[352,128], index: 2, kind: input, shape index: {}]   ;;  %s2611_s3 = inlined_call_operand.vmem [shape: bf16[256,64], index: 3, kind: input, shape index: {}]   ;;  %s2612_s4 = inlined_call_operand.hbm [shape: bf16[144,256], index: 4, kind: input, shape index: {}]   ;;  %s2613_s5 = inlined_call_operand.hbm [shape: f32[256,256], index: 5, kind: output, shape index: {0}]   ;;  %s2614_s6 = inlined_call_operand.vmem [shape: f32[256,64], index: 6, kind: output, shape index: {1}]  }
   0x1   :  { %13 = vsyncpa [#allocation4], 0 }
   0x2   :  { %15 = vsyncpa [#allocation4 + $0x1], 0  ;;  %s2186_s21 = smov 0   ;;  %s2188_s22 = smov 0  }
   0x3   :  { %s2190_s23 = smov 0   ;;  %s2192_s24 = smov 0  }
   0x4 LB: > { %s2207_s25 = sadd.s32 4294967295, %s2140_s24   ;;  %s1604_s26 = sadd.s32 4294967294, %s2140_s24   ;;  %s2140_s24 = sphi %s2192_s24, %s2630_s24   ;;  %s2136_s23 = sphi %s2190_s23, %s2629_s23   ;;  %s2132_s22 = sphi %s2188_s22, %s2628_s22   ;;  %s2128_s21 = sphi %s2186_s21, %s2627_s21  }
   0x5   : > { %s2211_s27 = sadd.s32 1, %s2140_s24   ;;  %s143_s28 = sadd.s32 1, %s2136_s23 }
   0x6   : > { %s140_s29 = ssub.s32 %s2140_s24, %s2211_s27  ;;  %p153_p0 = scmp.ne.s32.totalorder %s2136_s23, %s2132_s22 }
   0x7   : > { %p141_p1 = scmp.eq.s32.totalorder %s140_s29, 0  ;;  %p154_p2 = scmp.eq.s32.totalorder %s2207_s25, 3 }
   0x8   : > { %p159_p3 = scmp.ne.s32.totalorder %s2132_s22, %s2128_s21  ;;  %p160_p4 = scmp.eq.s32.totalorder %s1604_s26, 3 }
   0x9   : > { %s2222_s30 = scalar_select %p141_p1, %s2136_s23, %s143_s28  }
   0xa   : > { %p2224_p5 = por %p154_p2, %p153_p0  ;;  %p2228_p6 = por %p160_p4, %p159_p3 }
   0xb   : > { %p1605_p7 = scmp.ge.s32.totalorder %s2140_s24, 1  ;;  %p193_p8 = scmp.lt.s32.totalorder %s2140_s24, 5 }
   0xc   : > { %s2618_s7 = scalar_select %p2224_p5, 1, 0 }
   0xd   : > { %s2619_s8 = scalar_select %p2228_p6, 1, 0 }
   0xe   : > { %p2615_p9 = scmp.eq.s32.totalorder %s2207_s25, 0  ;;  %p2235_p10 = pnand %p1605_p7, %p193_p8 }
   0xf   : > { %s2142_s10 = smov [#allocation2]   ;;  %s2046_s15 = scalar_lea.hbm %s2612_s4, 2304 }
  0x10   : > { %s2620_s9 = scalar_select %p2235_p10, 1, 0 }
  0x11   : > { %s211_s11 = sshll.u32 %s2142_s10, 4  ;;  %p1837_p11 = pneg %p2235_p10  ;;  %s212_s11 = int_to_ptr.vmem [resolvable:$true] %s211_s11 }
  0x12   : > { %p2047_p13 = scmp.ne.s32.totalorder %s2612_s4, %s2046_s15  ;;  %p2053_p3 = scmp.lt.u32.totalorder %s2046_s15, %s2612_s4 }
  0x13   : > { %p2243_p12 = pnand %p2615_p9, %p1837_p11 }
  0x15   : > { %p2048_p0 = pneg %p2243_p12 }
  0x17   : > { %p2049_p1 = pnand %p2048_p0, %p2047_p13 }
  0x19   : > { %p2050_p2 = pneg %p2049_p1 }
  0x1b   : > { %p2055_p4 = pnand %p2053_p3, %p2050_p2 }
  0x1d   : > { %2058 = shalt.err (!%p2055_p4)
}
  0x1e   : > { %s2059_s20 = scalar_lea.vmem %s212_s11, 2304  ;;  %p2067_p9 = scmp.lt.s32.totalorder %s212_s11, %s212_s11 }
  0x1f   : > { %p2060_p7 = scmp.ne.s32.totalorder %s212_s11, %s2059_s20  ;;  %p2068_p6 = scmp.lt.s32.totalorder %s2059_s20, %s2059_s20 }
  0x21   : > { %p2062_p8 = pnand %p2060_p7, %p2048_p0  ;;  %p2069_p5 = por %p2068_p6, %p2067_p9 }
  0x23   : > { %p2063_p11 = pneg %p2062_p8 }
  0x25   : > { %p2070_p10 = pnand %p2069_p5, %p2063_p11 }
  0x27   : > { %2073 = shalt.err (!%p2070_p10)
}
  0x28   : > { %s2143_s26 = smov 128   ;;  %s2144_s28 = smov 8  }
  0x29   : > { %1840 = dma.hbm_to_vmem [thread:$0]  (!%p2243_p12), %s2612_s4, 2304, %s212_s11, [#allocation3], %s2143_s26, %s2143_s26, %s2144_s28  }
  0x2a   : > { %p2622_p13 = scmp.ne.s32.totalorder %s2620_s9, 0 }
  0x2b   : > { %p2623_p1 = scmp.eq.s32.totalorder (!%p2622_p13), %s2207_s25, 0 }
  0x2c   : > { %246 = sbr.rel (%p2622_p13) target bundleno = 1550 (0x60e), region = 40 }
  0x33   : > { %2119 = dma.done.wait (%p2623_p1), [#allocation3], 2304   ;;  %p2624_p0 = pmov %p2623_p1 }
  0x34   : > { %v1898_v0 = vld [vmem:[%s2610_s2 + $0x40] sm:$0xff]   ;;  %s1611_s15 = sshll.u32 %s2207_s25, 3  ;;  %v1900_v2 = vld [vmem:[%s2610_s2 + $0x48] sm:$0xff]   ;;  %v1902_v4 = vld [vmem:[%s2610_s2 + $0x50] sm:$0xff]   ;;  %v350_v34 = vlaneseq  ;;  %vm752_vm0 = vcmask 523264   ;;  %s2146_s10 = smov 126  }
  0x35   : > { %2121 = vsyncadd (%p2624_p0), [#allocation3], 4294964992  ;;  %v1899_v1 = vld [vmem:[%s2610_s2] sm:$0xff]   ;;  %1707 = vmatprep.subr.bf16.mxu0 %v1898_v0  ;;  %v1901_v3 = vld [vmem:[%s2610_s2 + $0x8] sm:$0xff]   ;;  %p288_p5 = scmp.lt.s32.totalorder %s1611_s15, 31  ;;  %s1706_s9 = sshll.u32 %s2207_s25, 11 }
  0x36   : > { %1708 = vmatpush3.bf16.msra.mxu0 %v1899_v1  ;;  %v1903_v5 = vld [vmem:[%s2610_s2 + $0x10] sm:$0xff]   ;;  %v1904_v6 = vld [vmem:[%s2610_s2 + $0x58] sm:$0xff]   ;;  %v1906_v8 = vld [vmem:[%s2610_s2 + $0x60] sm:$0xff]   ;;  %v2364_v35 = vshrl.u32 %v350_v34, 7  ;;  %p2625_p9 = scmp.ne.s32.totalorder %s2618_s7, 0  ;;  %s2148_s26 = smov [#allocation5]  }
  0x37   : > { %1709 = vmatprep.subr.bf16.mxu0 %v1900_v2  ;;  %s2632_s15 = smov (!%p288_p5, %s1611_s15), 31  ;;  %v1905_v7 = vld [vmem:[%s2610_s2 + $0x18] sm:$0xff]   ;;  %v1907_v9 = vld [vmem:[%s2610_s2 + $0x20] sm:$0xff]   ;;  %v1908_v10 = vld [vmem:[%s2610_s2 + $0x68] sm:$0xff]   ;;  %s2078_s28 = sshll.u32 %s2148_s26, 4  ;;  %s2079_s28 = int_to_ptr.vmem [resolvable:$false] %s2078_s28 }
  0x38   : > { %s2294_s12 = sshll.u32 %s2632_s15, 3  ;;  %v1909_v12 = vld [vmem:[%s2610_s2 + $0x28] sm:$0xff]   ;;  %v1910_v13 = vld [vmem:[%s2610_s2 + $0x70] sm:$0xff]   ;;  %v1912_v15 = vld [vmem:[%s2610_s2 + $0x78] sm:$0xff]   ;;  %v2370_v38 = vsub.s32 0, %v2364_v35 }
  0x39   : > { %s2303_s18 = scalar_lea.vmem %s2608_s0, %s2294_s12  ;;  %v1911_v14 = vld [vmem:[%s2610_s2 + $0x30] sm:$0xff]   ;;  %v1913_v16 = vld [vmem:[%s2610_s2 + $0x38] sm:$0xff]   ;;  %v1926_v17 = vld [vmem:[%s2611_s3] sm:$0xff]   ;;  %s2395_s29 = scalar_lea.vmem %s2614_s6, %s2294_s12 }
  0x3a   : > { %1710 = vmatpush3.bf16.msra.mxu0 %v1901_v3  ;;  %v1916_v11 = vld [vmem:[%s2303_s18 + $0x4] ss:$8 sps:$4 sm:$0xff]   ;;  %v1914_v18 = vld [vmem:[%s2303_s18] ss:$8 sps:$4 sm:$0xff]   ;;  %v1917_v19 = vld [vmem:[%s2303_s18 + $0x14] ss:$8 sps:$4 sm:$0xff]   ;;  %s2460_s16 = scalar_lea.vmem %s2609_s1, %s2294_s12 }
  0x3b   : > { %1711 = vmatprep.subr.bf16.mxu0 %v1902_v4  ;;  %522 = vmatprep.mubr.bf16.mxu0 %v1916_v11  ;;  %v1927_v20 = vld [vmem:[%s2611_s3 + $0x8] sm:$0xff]   ;;  %v1928_v21 = vld [vmem:[%s2611_s3 + $0x10] sm:$0xff]   ;;  %v1929_v24 = vld [vmem:[%s2611_s3 + $0x18] sm:$0xff]  }
  0x3c   : > { %v1919_v22 = vld [vmem:[%s2303_s18 + $0x10] ss:$8 sps:$4 sm:$0xff]   ;;  %v1920_v23 = vld [vmem:[%s2303_s18 + $0x24] ss:$8 sps:$4 sm:$0xff]   ;;  %v1922_v25 = vld [vmem:[%s2303_s18 + $0x20] ss:$8 sps:$4 sm:$0xff]  }
  0x3d   : > { %v1923_v26 = vld [vmem:[%s2303_s18 + $0x34] ss:$8 sps:$4 sm:$0xff]   ;;  %v1925_v27 = vld [vmem:[%s2303_s18 + $0x30] ss:$8 sps:$4 sm:$0xff]   ;;  %v1930_v28 = vld [vmem:[%s2611_s3 + $0x20] sm:$0xff]   ;;  %s2558_s18 = scalar_lea.hbm %s2613_s5, %s1706_s9 }
  0x3e   : > { %1712 = vmatpush3.bf16.msra.mxu0 %v1903_v5  ;;  %v1931_v29 = vld [vmem:[%s2611_s3 + $0x28] sm:$0xff]   ;;  %v1932_v30 = vld [vmem:[%s2611_s3 + $0x30] sm:$0xff]   ;;  %v1933_v31 = vld [vmem:[%s2611_s3 + $0x38] sm:$0xff]  }
  0x3f   : > { %1713 = vmatprep.subr.bf16.mxu0 %v1904_v6  ;;  %v1934_v32 = vld [vmem:[%s2611_s3 + $0x48] sm:$0xff]   ;;  %v1935_v33 = vld [vmem:[%s2611_s3 + $0x50] sm:$0xff]   ;;  %v348_v36 = vld [vmem:[%s2610_s2 + $0x80] sm:$0x1] }
  0x40   : > { %1799 = vmatprep.subr.bf16.mxu1 %v1934_v32  ;;  %v349_v37 = vunpack.c.l.bf16 %v348_v36 }
  0x41   : > { %1800 = vmatpush3.bf16.msra.mxu1 %v1934_v32 }
  0x42   : > { %1714 = vmatpush3.bf16.msra.mxu0 %v1905_v7  ;;  %1801 = vmatprep.subr.bf16.mxu1 %v1935_v33  ;;  %v353_v40 = vrot.slane %v349_v37, %v2370_v38 }
  0x43   : > { %1715 = vmatprep.subr.bf16.mxu0 %v1906_v8 }
  0x45   : > { %1802 = vmatpush3.bf16.msra.mxu1 %v1935_v33 }
  0x46   : > { %1716 = vmatpush3.bf16.msra.mxu0 %v1907_v9 }
  0x47   : > { %1717 = vmatprep.subr.bf16.mxu0 %v1908_v10 }
  0x4a   : > { %1718 = vmatpush3.bf16.msra.mxu0 %v1909_v12 }
  0x4b   : > { %1719 = vmatprep.subr.bf16.mxu0 %v1910_v13 }
  0x4e   : > { %1720 = vmatpush3.bf16.msra.mxu0 %v1911_v14 }
  0x4f   : > { %1721 = vmatprep.subr.bf16.mxu0 %v1912_v15 }
  0x52   : > { %1722 = vmatpush3.bf16.msra.mxu0 %v1913_v16 }
  0x53   : > { %1775 = vmatprep.subr.bf16.mxu0 %v1926_v17 }
  0x55   : > { %523 = vmatmul.mubr.bf16.vlgmr.msra.gmra.mrb[0].mxu0 %v1914_v18 }
  0x56   : > { %530 = vmatprep.mubr.bf16.mxu0 %v1917_v19  ;;  %1776 = vmatpush3.bf16.msra.mxu0 %v1926_v17 }
  0x57   : > { %1777 = vmatprep.subr.bf16.mxu0 %v1927_v20 }
  0x5a   : > { %1778 = vmatpush3.bf16.msra.mxu0 %v1927_v20  ;;  %v1936_v20 = vld [vmem:[%s2611_s3 + $0x58] sm:$0xff]  }
  0x5b   : > { %1779 = vmatprep.subr.bf16.mxu0 %v1928_v21  ;;  %1803 = vmatprep.subr.bf16.mxu1 %v1936_v20 }
  0x5c   : > { %1804 = vmatpush3.bf16.msra.mxu1 %v1936_v20 }
  0x5d   : > { %531 = vmatmul.mubr.bf16.gmra.mrb[4].mxu0 %v1919_v22  ;;  %v579_v22 = vld [vmem:[%s2611_s3 + $0x40] sm:$0x1] }
  0x5e   : > { %538 = vmatprep.mubr.bf16.mxu0 %v1920_v23  ;;  %1780 = vmatpush3.bf16.msra.mxu0 %v1928_v21  ;;  %v1937_v21 = vld [vmem:[%s2611_s3 + $0x60] sm:$0xff]   ;;  %v580_v23 = vunpack.c.l.bf16 %v579_v22 }
  0x5f   : > { %1781 = vmatprep.subr.bf16.mxu0 %v1929_v24  ;;  %1805 = vmatprep.subr.bf16.mxu1 %v1937_v21 }
  0x60   : > { %1806 = vmatpush3.bf16.msra.mxu1 %v1937_v21 }
  0x62   : > { %1782 = vmatpush3.bf16.msra.mxu0 %v1929_v24  ;;  %v588_v24 = vrot.slane %v580_v23, %v2370_v38 }
  0x63   : > { %1783 = vmatprep.subr.bf16.mxu0 %v1930_v28 }
  0x65   : > { %539 = vmatmul.mubr.bf16.gmra.mrb[8].mxu0 %v1922_v25 }
  0x66   : > { %546 = vmatprep.mubr.bf16.mxu0 %v1923_v26  ;;  %1784 = vmatpush3.bf16.msra.mxu0 %v1930_v28 }
  0x67   : > { %1785 = vmatprep.subr.bf16.mxu0 %v1931_v29 }
  0x6a   : > { %1786 = vmatpush3.bf16.msra.mxu0 %v1931_v29 }
  0x6b   : > { %1787 = vmatprep.subr.bf16.mxu0 %v1932_v30 }
  0x6d   : > { %547 = vmatmul.mubr.bf16.gmra.mrb[12].mxu0 %v1925_v27 }
  0x6e   : > { %1788 = vmatpush3.bf16.msra.mxu0 %v1932_v30 }
  0x6f   : > { %1789 = vmatprep.subr.bf16.mxu0 %v1933_v31 }
  0x72   : > { %1790 = vmatpush3.bf16.msra.mxu0 %v1933_v31 }
 0x128   : > { %v1723_v39 = vpop.f32.mrb[0].mxu0 }
 0x129   : > { %v1724_v41 = vpop.f32.mrb[1].mxu0 }
 0x12a   : > { %v1725_v42 = vadd.f32 %v1724_v41, %v1723_v39  ;;  %v1726_v43 = vpop.f32.mrb[2].mxu0 }
 0x12b   : > { %v1727_v44 = vpop.f32.mrb[3].mxu0 }
 0x12c   : > { %v525_v45 = vadd.f32 %v1725_v42, %v353_v40  ;;  %v1728_v46 = vadd.f32 %v1727_v44, %v1726_v43 }
 0x12e   : > { %v528_v47 = vadd.f32 %v1728_v46, %v353_v40  ;;  %v555_v48 = vmax.f32 %v525_v45, 0.0 }
 0x130   : > { %v556_v49 = vmax.f32 %v528_v47, 0.0  ;;  %v1729_v50 = vpop.f32.mrb[4].mxu0 }
 0x131   : > { %v1730_v51 = vpop.f32.mrb[5].mxu0 }
 0x132   : > { %v1731_v52 = vadd.f32 %v1730_v51, %v1729_v50  ;;  %v1732_v53 = vpop.f32.mrb[6].mxu0  ;;  %v581_v54 = vpack.c.bf16 %v556_v49, %v555_v48 }
 0x133   : > { %v1733_v55 = vpop.f32.mrb[7].mxu0 }
 0x134   : > { %v533_v56 = vadd.f32 %v1731_v52, %v353_v40  ;;  %v1734_v57 = vadd.f32 %v1733_v55, %v1732_v53  ;;  %1791 = vmatprep.mubr.bf16.mxu0 %v581_v54  ;;  %v718_v55 = vld [vmem:[%s2611_s3 + $0x68] sm:$0x1] }
 0x136   : > { %v536_v58 = vadd.f32 %v1734_v57, %v353_v40  ;;  %v557_v59 = vmax.f32 %v533_v56, 0.0  ;;  %v719_v56 = vunpack.c.l.bf16 %v718_v55  ;;  %v1938_v55 = vld [vmem:[%s2610_s2 + $0x88] sm:$0xff]  }
 0x137   : > { %1815 = vmatprep.subr.bf16.mxu0 %v1938_v55 }
 0x138   : > { %v558_v60 = vmax.f32 %v536_v58, 0.0  ;;  %v1735_v61 = vpop.f32.mrb[8].mxu0  ;;  %v727_v57 = vrot.slane %v719_v56, %v2370_v38 }
 0x139   : > { %v1736_v62 = vpop.f32.mrb[9].mxu0 }
 0x13a   : > { %v582_v63 = vpack.c.bf16 %v558_v60, %v557_v59  ;;  %v1737_v0 = vadd.f32 %v1736_v62, %v1735_v61  ;;  %v1738_v1 = vpop.f32.mrb[10].mxu0 }
 0x13b   : > { %v1739_v2 = vpop.f32.mrb[11].mxu0 }
 0x13c   : > { %v541_v3 = vadd.f32 %v1737_v0, %v353_v40  ;;  %v1740_v4 = vadd.f32 %v1739_v2, %v1738_v1  ;;  %1792 = vmatmul.mubr.bf16.vlgmr.msra.gmra.mrb[16].mxu0 %v582_v63 }
 0x13d   : > { %1816 = vmatpush3.bf16.msra.mxu0 %v1938_v55 }
 0x13e   : > { %v544_v5 = vadd.f32 %v1740_v4, %v353_v40  ;;  %v559_v6 = vmax.f32 %v541_v3, 0.0 }
 0x140   : > { %v560_v7 = vmax.f32 %v544_v5, 0.0  ;;  %v1741_v8 = vpop.f32.mrb[12].mxu0 }
 0x141   : > { %v1742_v9 = vpop.f32.mrb[13].mxu0 }
 0x142   : > { %v1743_v10 = vadd.f32 %v1742_v9, %v1741_v8  ;;  %v1744_v11 = vpop.f32.mrb[14].mxu0  ;;  %v583_v12 = vpack.c.bf16 %v560_v7, %v559_v6 }
 0x143   : > { %v1745_v13 = vpop.f32.mrb[15].mxu0 }
 0x144   : > { %v549_v14 = vadd.f32 %v1743_v10, %v353_v40  ;;  %v1746_v15 = vadd.f32 %v1745_v13, %v1744_v11  ;;  %1795 = vmatprep.mubr.bf16.mxu0 %v583_v12  ;;  %v2145_v10 = vmov 0  }
 0x145   : > { %1888 = vset.pattern.permute.xlu1 %v2145_v10  ;;  %1890 = vset.pattern.permute.xlu0 %v2145_v10 }
 0x146   : > { %v552_v16 = vadd.f32 %v1746_v15, %v353_v40  ;;  %v561_v17 = vmax.f32 %v549_v14, 0.0 }
 0x148   : > { %v562_v18 = vmax.f32 %v552_v16, 0.0 }
 0x14a   : > { %v584_v19 = vpack.c.bf16 %v562_v18, %v561_v17 }
 0x14c   : > { %1796 = vmatmul.mubr.bf16.gmra.mrb[20].mxu0 %v584_v19 }
 0x20f   : > { %v1793_v25 = vpop.f32.mrb[16].mxu0 }
 0x210   : > { %v680_v26 = vadd.f32 %v1793_v25, %v588_v24  ;;  %v671_v27 = vpop.f32.mrb[17].mxu0 }
 0x211   : > { %v672_v28 = vadd.f32 %v671_v27, %v588_v24  ;;  %v1794_v29 = vpop.f32.mrb[18].mxu0 }
 0x212   : > { %v683_v30 = vadd.f32 %v1794_v29, %v588_v24  ;;  %v674_v31 = vpop.f32.mrb[19].mxu0  ;;  %v704_v33 = vmax.f32 %v680_v26, 0.0 }
 0x213   : > { %v675_v32 = vadd.f32 %v674_v31, %v588_v24  ;;  %v702_v36 = vmax.f32 %v672_v28, 0.0 }
 0x214   : > { %v705_v34 = vmax.f32 %v683_v30, 0.0 }
 0x215   : > { %v703_v37 = vmax.f32 %v675_v32, 0.0 }
 0x216   : > { %v721_v39 = vpack.c.bf16 %v705_v34, %v704_v33 }
 0x217   : > { %v720_v40 = vpack.c.bf16 %v703_v37, %v702_v36  ;;  %v840_v36 = vld [vmem:[%s2460_s16 + $0x10] sm:$0xff]  ;;  %v838_v37 = vld [vmem:[%s2460_s16] sm:$0xff] }
 0x219   : > { %1807 = vmatprep.mubr.msk.bf16.mxu1 %vm752_vm0, %v720_v40 }
 0x21a   : > { %1808 = vmatmul.mubr.msk.bf16.vlgmr.msra.gmra.mrb[0].mxu1 %vm752_vm0, %v721_v39 }
 0x21f   : > { %v1797_v41 = vpop.f32.mrb[20].mxu0 }
 0x220   : > { %v696_v42 = vadd.f32 %v1797_v41, %v588_v24  ;;  %v687_v43 = vpop.f32.mrb[21].mxu0 }
 0x221   : > { %v688_v44 = vadd.f32 %v687_v43, %v588_v24  ;;  %v1798_v45 = vpop.f32.mrb[22].mxu0  ;;  %v841_v43 = vld [vmem:[%s2460_s16 + $0x18] sm:$0xff] }
 0x222   : > { %v699_v46 = vadd.f32 %v1798_v45, %v588_v24  ;;  %v690_v47 = vpop.f32.mrb[23].mxu0  ;;  %v708_v49 = vmax.f32 %v696_v42, 0.0 }
 0x223   : > { %v691_v48 = vadd.f32 %v690_v47, %v588_v24  ;;  %v706_v51 = vmax.f32 %v688_v44, 0.0 }
 0x224   : > { %v709_v50 = vmax.f32 %v699_v46, 0.0 }
 0x225   : > { %v707_v52 = vmax.f32 %v691_v48, 0.0  ;;  %v839_v48 = vld [vmem:[%s2460_s16 + $0x8] sm:$0xff] }
 0x226   : > { %v723_v53 = vpack.c.bf16 %v709_v50, %v708_v49 }
 0x227   : > { %v722_v54 = vpack.c.bf16 %v707_v52, %v706_v51  ;;  %v2147_v52 = vmov 1  }
 0x229   : > { %1811 = vmatprep.mubr.msk.bf16.mxu1 %vm752_vm0, %v722_v54  ;;  %v842_v54 = vld [vmem:[%s2460_s16 + $0x20] sm:$0xff] }
 0x22a   : > { %1812 = vmatmul.mubr.msk.bf16.gmra.mrb[4].mxu1 %vm752_vm0, %v723_v53 }
 0x22b   : > { %1316 = vmatprep.mubr.bf16.mxu1 %v2145_v10 }
 0x2ed   : > { %v1809_v58 = vpop.f32.mrb[0].mxu1 }
 0x2ee   : > { %v2397_v59 = vadd.f32 %v1809_v58, %v727_v57  ;;  %v799_v60 = vpop.f32.mrb[1].mxu1 }
 0x2ef   : > { %v2399_v61 = vadd.f32 %v799_v60, %v727_v57  ;;  %v1810_v62 = vpop.f32.mrb[2].mxu1 }
 0x2f0   : > { %832 = vst.msk [vmem:[%s2395_s29 + $0x10] sm:$0xff] %vm752_vm0, %v2397_v59  ;;  %v848_v63 = vmul.f32 0.5, %v2397_v59  ;;  %v2405_v0 = vadd.f32 %v1810_v62, %v727_v57  ;;  %v802_v1 = vpop.f32.mrb[3].mxu1 }
 0x2f1   : > { %830 = vst.msk [vmem:[%s2395_s29] sm:$0xff] %vm752_vm0, %v2399_v61  ;;  %v846_v2 = vmul.f32 0.5, %v2399_v61  ;;  %v2411_v3 = vadd.f32 %v802_v1, %v727_v57 }
 0x2f2   : > { %v858_v4 = vmul.f32 1.442695, %v848_v63  ;;  %833 = vst.msk [vmem:[%s2395_s29 + $0x18] sm:$0xff] %vm752_vm0, %v2405_v0  ;;  %v849_v5 = vmul.f32 0.5, %v2405_v0  ;;  %v845_v63 = vld [vmem:[%s2460_s16 + $0x38] sm:$0xff] }
 0x2f3   : > { %v854_v6 = vmul.f32 1.442695, %v846_v2  ;;  %831 = vst.msk [vmem:[%s2395_s29 + $0x8] sm:$0xff] %vm752_vm0, %v2411_v3  ;;  %v847_v7 = vmul.f32 0.5, %v2411_v3  ;;  %v843_v2 = vld [vmem:[%s2460_s16 + $0x28] sm:$0xff] }
 0x2f4   : > { %1966 = vpow2.f32 %v858_v4  ;;  %v860_v8 = vmul.f32 1.442695, %v849_v5  ;;  %v1940_v5 = vld [vmem:[%s2610_s2 + $0x98] sm:$0xff]  }
 0x2f5   : > { %1968 = vpow2.f32 %v854_v6  ;;  %v856_v9 = vmul.f32 1.442695, %v847_v7 }
 0x2f6   : > { %1970 = vpow2.f32 %v860_v8  ;;  %v1941_v8 = vld [vmem:[%s2610_s2 + $0xa0] sm:$0xff]  }
 0x2f7   : > { %1972 = vpow2.f32 %v856_v9 }
 0x2fd   : > { %v1813_v11 = vpop.f32.mrb[4].mxu1 }
 0x2fe   : > { %v1967_v12 = vpop.eup %1966  ;;  %v2424_v13 = vadd.f32 %v1813_v11, %v727_v57  ;;  %v815_v14 = vpop.f32.mrb[5].mxu1  ;;  %v1942_v11 = vld [vmem:[#allocation2] ss:$8 sps:$4 sm:$0xff]  }
 0x2ff   : > { %v1969_v15 = vpop.eup %1968  ;;  %v2426_v16 = vadd.f32 %v815_v14, %v727_v57  ;;  %882 = vrot.lane.b32.xlu1 %v1967_v12, %s2146_s10  ;;  %v1814_v17 = vpop.f32.mrb[6].mxu1  ;;  %v1944_v12 = vld [vmem:[#allocation2 + $0x4] ss:$8 sps:$4 sm:$0xff]   ;;  %v1945_v14 = vld [vmem:[#allocation2 + $0x10] ss:$8 sps:$4 sm:$0xff]  }
 0x300   : > { %836 = vst.msk [vmem:[%s2395_s29 + $0x30] sm:$0xff] %vm752_vm0, %v2424_v13  ;;  %v2432_v18 = vadd.f32 %v1814_v17, %v727_v57  ;;  %v818_v19 = vpop.f32.mrb[7].mxu1  ;;  %878 = vrot.lane.b32.xlu0 %v1969_v15, %s2146_s10  ;;  %v852_v20 = vmul.f32 0.5, %v2424_v13  ;;  %v1971_v23 = vpop.eup %1970  ;;  %1284 = vmatprep.subr.bf16.mxu1 %v1944_v12  ;;  %v1950_v15 = vld [vmem:[#allocation2 + $0x24] ss:$8 sps:$4 sm:$0xff]  }
 0x301   : > { %834 = vst.msk [vmem:[%s2395_s29 + $0x20] sm:$0xff] %vm752_vm0, %v2426_v16  ;;  %v850_v21 = vmul.f32 0.5, %v2426_v16  ;;  %v2440_v22 = vadd.f32 %v818_v19, %v727_v57  ;;  %v1973_v24 = vpop.eup %1972  ;;  %1285 = vmatpush1.bf16.msra.mxu1 %v1942_v11  ;;  %v1953_v17 = vld [vmem:[#allocation2 + $0x34] ss:$8 sps:$4 sm:$0xff]   ;;  %v1956_v19 = vld [vmem:[#allocation2 + $0x44] ss:$8 sps:$4 sm:$0xff]  }
 0x302   : > { %837 = vst.msk [vmem:[%s2395_s29 + $0x38] sm:$0xff] %vm752_vm0, %v2432_v18  ;;  %v853_v26 = vmul.f32 0.5, %v2432_v18  ;;  %v866_v28 = vmul.f32 1.442695, %v852_v20  ;;  %v1954_v20 = vld [vmem:[#allocation2 + $0x40] ss:$8 sps:$4 sm:$0xff]  }
 0x303   : > { %v862_v25 = vmul.f32 1.442695, %v850_v21  ;;  %835 = vst.msk [vmem:[%s2395_s29 + $0x28] sm:$0xff] %vm752_vm0, %v2440_v22  ;;  %v851_v27 = vmul.f32 0.5, %v2440_v22  ;;  %884 = vrot.lane.b32.xlu1 %v1971_v23, %s2146_s10  ;;  %v1959_v21 = vld [vmem:[#allocation2 + $0x54] ss:$8 sps:$4 sm:$0xff]  }
 0x304   : > { %880 = vrot.lane.b32.xlu0 %v1973_v24, %s2146_s10  ;;  %v868_v30 = vmul.f32 1.442695, %v853_v26  ;;  %v918_v24 = vld [vmem:[%s2611_s3 + $0x70] sm:$0x1]  ;;  %s2080_s29 = scalar_lea.vmem %s2079_s28, 4096 }
 0x305   : > { %1974 = vpow2.f32 %v862_v25  ;;  %v864_v29 = vmul.f32 1.442695, %v851_v27  ;;  %v919_v27 = vunpack.c.l.bf16 %v918_v24 }
 0x307   : > { %1976 = vpow2.f32 %v864_v29 }
 0x308   : > { %1978 = vpow2.f32 %v866_v28  ;;  %v920_v28 = vld [vmem:[%s2611_s3 + $0x78] sm:$0x1] }
 0x309   : > { %1980 = vpow2.f32 %v868_v30  ;;  %v1020_v30 = vsub.s32 1, %v2364_v35 }
 0x30f   : > { %v1975_v31 = vpop.eup %1974 }
 0x310   : > { %886 = vrot.lane.b32.xlu0 %v1975_v31, %s2146_s10  ;;  %v921_v31 = vunpack.c.l.bf16 %v920_v28 }
 0x311   : > { %v1977_v32 = vpop.eup %1976 }
 0x312   : > { %888 = vrot.lane.b32.xlu1 %v1977_v32, %s2146_s10  ;;  %v1979_v33 = vpop.eup %1978  ;;  %v965_v32 = vrot.slane %v919_v27, %v2370_v38 }
 0x313   : > { %v1981_v34 = vpop.eup %1980 }
 0x314   : > { %890 = vrot.lane.b32.xlu0 %v1979_v33, %s2146_s10 }
 0x316   : > { %892 = vrot.lane.b32.xlu1 %v1981_v34, %s2146_s10 }
 0x371   : > { %v883_v39 = vpop.permute.xlu1 %882 }
 0x372   : > { %v904_v40 = vmul.f32 %v883_v39, %v840_v36  ;;  %v879_v41 = vpop.permute.xlu0 %878  ;;  %v1021_v36 = vrot.slane %v919_v27, %v1020_v30  ;;  %v977_v39 = vrot.slane %v921_v31, %v2370_v38  ;;  %v1960_v30 = vld [vmem:[#allocation2 + $0x60] ss:$8 sps:$4 sm:$0xff]   ;;  %v1965_v31 = vld [vmem:[#allocation2 + $0x74] ss:$8 sps:$4 sm:$0xff]  }
 0x373   : > { %v902_v42 = vmul.f32 %v879_v41, %v838_v37 }
 0x374   : > { %v912_v44 = vadd.f32 %v904_v40, %v2397_v59  ;;  %v844_v59 = vld [vmem:[%s2460_s16 + $0x30] sm:$0xff]  ;;  %s277_s16 = sand.u32 1, %s2132_s22  }
 0x375   : > { %v910_v45 = vadd.f32 %v902_v42, %v2399_v61  ;;  %v885_v46 = vpop.permute.xlu1 %884  ;;  %v1939_v61 = vld [vmem:[%s2610_s2 + $0x90] sm:$0xff]   ;;  %s1610_s12 = sshll.u32 %s277_s16, 7  ;;  %s2567_s25 = scalar_lea.sflag [#allocation4], %s277_s16 }
 0x376   : > { %v905_v47 = vmul.f32 %v885_v46, %v841_v43  ;;  %934 = vperm.xlu1 %1888, %v912_v44   ;;  %v881_v49 = vpop.permute.xlu0 %880  ;;  %1817 = vmatprep.subr.bf16.mxu0 %v1939_v61  ;;  %s2534_s11 = scalar_lea.vmem [#allocation5], %s1610_s12 }
 0x377   : > { %924 = vperm.xlu0 %1890, %v910_v45   ;;  %v903_v51 = vmul.f32 %v881_v49, %v839_v48  ;;  %1818 = vmatpush3.bf16.msra.mxu0 %v1939_v61  ;;  %s1489_s17 = sshll.u32 %s2534_s11, 4  ;;  %s2560_s17 = int_to_ptr.vmem [resolvable:$true] %s1489_s17 }
 0x378   : > { %v913_v50 = vadd.f32 %v905_v47, %v2405_v0  ;;  %1819 = vmatprep.subr.bf16.mxu0 %v1940_v5  ;;  %s2074_s15 = scalar_lea.vmem %s2560_s17, 2048  ;;  %p2081_p2 = scmp.lt.s32.totalorder %s2560_s17, %s2079_s28 }
 0x379   : > { %v911_v53 = vadd.f32 %v903_v51, %v2411_v3  ;;  %p2075_p6 = scmp.ne.s32.totalorder %s2560_s17, %s2074_s15  ;;  %p2082_p3 = scmp.lt.s32.totalorder %s2080_s29, %s2074_s15 }
 0x37a   : > { %1889 = vset.pattern.permute.xlu1 %v2147_v52 }
 0x37b   : > { %995 = vperm.xlu1 %1889, %v912_v44   ;;  %939 = vperm.xlu0 %1890, %v913_v50   ;;  %p2076_p10 = pnand %p2075_p6, %p2625_p9  ;;  %p2083_p4 = por %p2082_p3, %p2081_p2 }
 0x37c   : > { %1820 = vmatpush3.bf16.msra.mxu0 %v1940_v5 }
 0x37d   : > { %1821 = vmatprep.subr.bf16.mxu0 %v1941_v8  ;;  %p2077_p12 = pneg %p2076_p10 }
 0x37f   : > { %987 = vperm.xlu1 %1889, %v910_v45   ;;  %1892 = vset.pattern.permute.xlu0 %v2147_v52  ;;  %p2084_p7 = pnand %p2083_p4, %p2077_p12 }
 0x380   : > { %991 = vperm.xlu0 %1892, %v911_v53   ;;  %1822 = vmatpush3.bf16.msra.mxu0 %v1941_v8 }
 0x382   : > { %v887_v56 = vpop.permute.xlu0 %886 }
 0x383   : > { %v906_v57 = vmul.f32 %v887_v56, %v842_v54  ;;  %999 = vperm.xlu1 %1889, %v913_v50  }
 0x384   : > { %v889_v58 = vpop.permute.xlu1 %888  ;;  %1893 = vset.pattern.permute.xlu0 %v2145_v10 }
 0x385   : > { %v914_v60 = vadd.f32 %v906_v57, %v2426_v16  ;;  %v907_v7 = vmul.f32 %v889_v58, %v843_v2  ;;  %v1948_v16 = vld [vmem:[#allocation2 + $0x20] ss:$8 sps:$4 sm:$0xff]  }
 0x386   : > { %v891_v62 = vpop.permute.xlu0 %890 }
 0x387   : > { %v908_v0 = vmul.f32 %v891_v62, %v844_v59  ;;  %1891 = vset.pattern.permute.xlu1 %v2145_v10  ;;  %944 = vperm.xlu0 %1893, %v914_v60   ;;  %v915_v9 = vadd.f32 %v907_v7, %v2440_v22  ;;  %v1957_v22 = vld [vmem:[#allocation2 + $0x50] ss:$8 sps:$4 sm:$0xff]  }
 0x388   : > { %v893_v1 = vpop.permute.xlu1 %892  ;;  %929 = vperm.xlu1 %1891, %v911_v53  }
 0x389   : > { %v916_v3 = vadd.f32 %v908_v0, %v2424_v13  ;;  %v909_v4 = vmul.f32 %v893_v1, %v845_v63  ;;  %v1947_v13 = vld [vmem:[#allocation2 + $0x14] ss:$8 sps:$4 sm:$0xff]  }
 0x38a   : > { %1286 = vmatprep.subr.bf16.mxu1 %v1947_v13 }
 0x38b   : > { %v917_v6 = vadd.f32 %v909_v4, %v2432_v18  ;;  %1287 = vmatpush1.bf16.msra.mxu1 %v1945_v14  ;;  %v1951_v18 = vld [vmem:[#allocation2 + $0x30] ss:$8 sps:$4 sm:$0xff]  }
 0x38c   : > { %954 = vperm.xlu1 %1891, %v916_v3   ;;  %1288 = vmatprep.subr.bf16.mxu1 %v1950_v15 }
 0x38d   : > { %959 = vperm.xlu0 %1893, %v917_v6  }
 0x38f   : > { %1289 = vmatpush1.bf16.msra.mxu1 %v1948_v16 }
 0x390   : > { %1894 = vset.pattern.permute.xlu1 %v2147_v52  ;;  %1290 = vmatprep.subr.bf16.mxu1 %v1953_v17 }
 0x391   : > { %1896 = vset.pattern.permute.xlu0 %v2147_v52  ;;  %1003 = vperm.xlu1 %1894, %v914_v60  }
 0x392   : > { %1007 = vperm.xlu0 %1896, %v915_v9  }
 0x393   : > { %1291 = vmatpush1.bf16.msra.mxu1 %v1951_v18 }
 0x394   : > { %1292 = vmatprep.subr.bf16.mxu1 %v1956_v19 }
 0x395   : > { %1895 = vset.pattern.permute.xlu1 %v2145_v10 }
 0x396   : > { %949 = vperm.xlu1 %1895, %v915_v9  }
 0x397   : > { %1293 = vmatpush1.bf16.msra.mxu1 %v1954_v20 }
 0x398   : > { %1294 = vmatprep.subr.bf16.mxu1 %v1959_v21 }
 0x39a   : > { %1897 = vset.pattern.permute.xlu1 %v2147_v52 }
 0x39b   : > { %1011 = vperm.xlu1 %1897, %v916_v3   ;;  %1295 = vmatpush1.bf16.msra.mxu1 %v1957_v22 }
 0x39f   : > { %1015 = vperm.xlu1 %1897, %v917_v6  }
 0x3f5   : > { %v935_v23 = vpop.permute.xlu1 %934 }
 0x3f6   : > { %v925_v25 = vpop.permute.xlu0 %924  ;;  %v968_v41 = vmul.f32 %v965_v32, %v935_v23 }
 0x3f7   : > { %v966_v40 = vmul.f32 %v965_v32, %v925_v25 }
 0x3f8   : > { %v980_v35 = vadd.f32 %v977_v39, %v968_v41 }
 0x3f9   : > { %v978_v48 = vadd.f32 %v977_v39, %v966_v40 }
 0x3fa   : > { %v996_v26 = vpop.permute.xlu1 %995  ;;  %v940_v33 = vpop.permute.xlu0 %939 }
 0x3fb   : > { %v969_v37 = vmul.f32 %v965_v32, %v940_v33  ;;  %v1024_v44 = vmul.f32 %v1021_v36, %v996_v26  ;;  %v1054_v33 = vld [vmem:[%s2610_s2 + $0xa8] sm:$0x1] }
 0x3fd   : > { %v981_v45 = vadd.f32 %v977_v39, %v969_v37  ;;  %v1032_v54 = vadd.f32 %v1024_v44, %v980_v35 }
 0x3fe   : > { %v988_v29 = vpop.permute.xlu1 %987 }
 0x3ff   : > { %v1022_v43 = vmul.f32 %v1021_v36, %v988_v29  ;;  %v992_v46 = vpop.permute.xlu0 %991  ;;  %v1040_v61 = vmax.f32 %v1032_v54, 0.0  ;;  %v1962_v29 = vld [vmem:[#allocation2 + $0x64] ss:$8 sps:$4 sm:$0xff]  }
 0x400   : > { %v1023_v52 = vmul.f32 %v1021_v36, %v992_v46  ;;  %1296 = vmatprep.subr.bf16.mxu1 %v1962_v29 }
 0x401   : > { %v1030_v51 = vadd.f32 %v1022_v43, %v978_v48  ;;  %1297 = vmatpush1.bf16.msra.mxu1 %v1960_v30 }
 0x402   : > { %v1000_v34 = vpop.permute.xlu1 %999  ;;  %1298 = vmatprep.subr.bf16.mxu1 %v1965_v31 }
 0x403   : > { %v1025_v42 = vmul.f32 %v1021_v36, %v1000_v34  ;;  %v1038_v59 = vmax.f32 %v1030_v51, 0.0  ;;  %v1055_v34 = vunpack.c.l.bf16 %v1054_v33 }
 0x405   : > { %v1033_v50 = vadd.f32 %v1025_v42, %v981_v45 }
 0x406   : > { %v945_v55 = vpop.permute.xlu0 %944 }
 0x407   : > { %v930_v47 = vpop.permute.xlu1 %929  ;;  %v1041_v58 = vmax.f32 %v1033_v50, 0.0  ;;  %v970_v2 = vmul.f32 %v965_v32, %v945_v55 }
 0x408   : > { %v967_v49 = vmul.f32 %v965_v32, %v930_v47 }
 0x409   : > { %v1057_v1 = vpack.c.bf16 %v1041_v58, %v1040_v61  ;;  %v982_v6 = vadd.f32 %v977_v39, %v970_v2 }
 0x40a   : > { %v979_v53 = vadd.f32 %v977_v39, %v967_v49 }
 0x40b   : > { %v955_v56 = vpop.permute.xlu1 %954 }
 0x40c   : > { %v1031_v57 = vadd.f32 %v1023_v52, %v979_v53  ;;  %v960_v62 = vpop.permute.xlu0 %959  ;;  %v972_v12 = vmul.f32 %v965_v32, %v955_v56 }
 0x40d   : > { %v973_v15 = vmul.f32 %v965_v32, %v960_v62 }
 0x40e   : > { %v1039_v60 = vmax.f32 %v1031_v57, 0.0  ;;  %v984_v19 = vadd.f32 %v977_v39, %v972_v12 }
 0x40f   : > { %v985_v22 = vadd.f32 %v977_v39, %v973_v15 }
 0x410   : > { %v1056_v63 = vpack.c.bf16 %v1039_v60, %v1038_v59  ;;  %v1004_v0 = vpop.permute.xlu1 %1003 }
 0x411   : > { %v1026_v3 = vmul.f32 %v1021_v36, %v1004_v0  ;;  %v1008_v4 = vpop.permute.xlu0 %1007 }
 0x412   : > { %1823 = vmatprep.mubr.msk.bf16.mxu0 %vm752_vm0, %v1056_v63  ;;  %v1027_v9 = vmul.f32 %v1021_v36, %v1008_v4 }
 0x413   : > { %1824 = vmatmul.mubr.msk.bf16.vlgmr.msra.gmra.mrb[24].mxu0 %vm752_vm0, %v1057_v1  ;;  %v1034_v8 = vadd.f32 %v1026_v3, %v982_v6  ;;  %v1189_v1 = vld [vmem:[#allocation2 + $0x80] sm:$0x11] }
 0x414   : > { %v1190_v2 = vunpack.c.l.bf16 %v1189_v1  ;;  %v1191_v3 = vunpack.c.h.bf16 %v1189_v1 }
 0x415   : > { %v950_v5 = vpop.permute.xlu1 %949  ;;  %v1042_v17 = vmax.f32 %v1034_v8, 0.0 }
 0x416   : > { %v971_v7 = vmul.f32 %v965_v32, %v950_v5  ;;  %v1963_v32 = vld [vmem:[#allocation2 + $0x70] ss:$8 sps:$4 sm:$0xff]   ;;  %v2514_v4 = vrot.slane %v1190_v2, %v2370_v38  ;;  %v2517_v5 = vrot.slane %v1191_v3, %v2370_v38 }
 0x417   : > { %1299 = vmatpush1.bf16.msra.mxu1 %v1963_v32 }
 0x418   : > { %v983_v11 = vadd.f32 %v977_v39, %v971_v7 }
 0x41a   : > { %v1035_v13 = vadd.f32 %v1027_v9, %v983_v11  ;;  %v1012_v14 = vpop.permute.xlu1 %1011 }
 0x41b   : > { %v1028_v16 = vmul.f32 %v1021_v36, %v1012_v14 }
 0x41c   : > { %v1043_v18 = vmax.f32 %v1035_v13, 0.0 }
 0x41d   : > { %v1036_v23 = vadd.f32 %v1028_v16, %v984_v19 }
 0x41e   : > { %v1058_v20 = vpack.c.bf16 %v1043_v18, %v1042_v17  ;;  %v1016_v21 = vpop.permute.xlu1 %1015 }
 0x41f   : > { %v1029_v24 = vmul.f32 %v1021_v36, %v1016_v21  ;;  %v1044_v26 = vmax.f32 %v1036_v23, 0.0  ;;  %v1063_v36 = vrot.slane %v1055_v34, %v2370_v38 }
 0x420   : > { %1827 = vmatprep.mubr.msk.bf16.mxu0 %vm752_vm0, %v1058_v20 }
 0x421   : > { %v1037_v25 = vadd.f32 %v1029_v24, %v985_v22 }
 0x423   : > { %v1045_v27 = vmax.f32 %v1037_v25, 0.0 }
 0x425   : > { %v1059_v28 = vpack.c.bf16 %v1045_v27, %v1044_v26 }
 0x427   : > { %1828 = vmatmul.mubr.msk.bf16.gmra.mrb[28].mxu0 %vm752_vm0, %v1059_v28 }
 0x4e6   : > { %v1825_v37 = vpop.f32.mrb[24].mxu0 }
 0x4e7   : > { %v1143_v39 = vadd.f32 %v1825_v37, %v1063_v36  ;;  %v1134_v40 = vpop.f32.mrb[25].mxu0 }
 0x4e8   : > { %v1135_v41 = vadd.f32 %v1134_v40, %v1063_v36  ;;  %v1826_v42 = vpop.f32.mrb[26].mxu0 }
 0x4e9   : > { %v1146_v43 = vadd.f32 %v1826_v42, %v1063_v36  ;;  %v1137_v44 = vpop.f32.mrb[27].mxu0  ;;  %v1167_v46 = vmax.f32 %v1143_v39, 0.0 }
 0x4ea   : > { %v1138_v45 = vadd.f32 %v1137_v44, %v1063_v36  ;;  %v1165_v48 = vmax.f32 %v1135_v41, 0.0 }
 0x4eb   : > { %v1168_v47 = vmax.f32 %v1146_v43, 0.0 }
 0x4ec   : > { %v1166_v49 = vmax.f32 %v1138_v45, 0.0 }
 0x4ed   : > { %v1193_v35 = vpack.c.bf16 %v1168_v47, %v1167_v46 }
 0x4ee   : > { %v1192_v50 = vpack.c.bf16 %v1166_v49, %v1165_v48 }
 0x4f0   : > { %1317 = vmatmul.mubr.bf16.vlgmr.msra.gmra.mrb[8].mxu1 %v1192_v50 }
 0x4f1   : > { %1326 = vmatprep.mubr.bf16.mxu1 %v2145_v10 }
 0x4f8   : > { %1327 = vmatmul.mubr.bf16.gmra.mrb[12].mxu1 %v1193_v35 }
 0x4f9   : > { %1336 = vmatprep.mubr.bf16.mxu1 %v2145_v10 }
 0x4fa   : > { %v1829_v51 = vpop.f32.mrb[28].mxu0 }
 0x4fb   : > { %v1159_v52 = vadd.f32 %v1829_v51, %v1063_v36  ;;  %v1150_v53 = vpop.f32.mrb[29].mxu0 }
 0x4fc   : > { %v1151_v54 = vadd.f32 %v1150_v53, %v1063_v36  ;;  %v1830_v55 = vpop.f32.mrb[30].mxu0 }
 0x4fd   : > { %v1162_v56 = vadd.f32 %v1830_v55, %v1063_v36  ;;  %v1153_v57 = vpop.f32.mrb[31].mxu0  ;;  %v1171_v59 = vmax.f32 %v1159_v52, 0.0 }
 0x4fe   : > { %v1154_v58 = vadd.f32 %v1153_v57, %v1063_v36  ;;  %v1169_v61 = vmax.f32 %v1151_v54, 0.0 }
 0x4ff   : > { %v1172_v60 = vmax.f32 %v1162_v56, 0.0 }
 0x500   : > { %v1170_v62 = vmax.f32 %v1154_v58, 0.0 }
 0x501   : > { %v1195_v63 = vpack.c.bf16 %v1172_v60, %v1171_v59 }
 0x502   : > { %v1194_v0 = vpack.c.bf16 %v1170_v62, %v1169_v61 }
 0x504   : > { %1337 = vmatmul.mubr.bf16.gmra.mrb[16].mxu1 %v1194_v0 }
 0x505   : > { %1346 = vmatprep.mubr.bf16.mxu1 %v2145_v10 }
 0x50c   : > { %1347 = vmatmul.mubr.bf16.gmra.mrb[20].mxu1 %v1195_v63 }
 0x5c3   : > { %v1318_v6 = vpop.f32.mrb[8].mxu1 }
 0x5c4   : > { %v1319_v7 = vadd.f32 %v1318_v6, %v2514_v4  ;;  %v1320_v8 = vpop.f32.mrb[9].mxu1 }
 0x5c5   : > { %v1321_v9 = vadd.f32 %v1320_v8, %v2517_v5  ;;  %v1322_v11 = vpop.f32.mrb[10].mxu1 }
 0x5c6   : > { %v1682_v12 = vmul.f32 -1.442695, %v1319_v7  ;;  %v1323_v10 = vadd.f32 %v1322_v11, %v2514_v4  ;;  %v1324_v13 = vpop.f32.mrb[11].mxu1 }
 0x5c7   : > { %v1683_v14 = vmul.f32 -1.442695, %v1321_v9  ;;  %v1325_v15 = vadd.f32 %v1324_v13, %v2517_v5 }
 0x5c8   : > { %1982 = vpow2.f32 %v1682_v12  ;;  %v1684_v16 = vmul.f32 -1.442695, %v1323_v10 }
 0x5c9   : > { %1984 = vpow2.f32 %v1683_v14  ;;  %v1685_v17 = vmul.f32 -1.442695, %v1325_v15 }
 0x5ca   : > { %1986 = vpow2.f32 %v1684_v16 }
 0x5cb   : > { %1988 = vpow2.f32 %v1685_v17  ;;  %v1328_v38 = vpop.f32.mrb[12].mxu1 }
 0x5cc   : > { %v1329_v18 = vadd.f32 %v1328_v38, %v2514_v4  ;;  %v1330_v19 = vpop.f32.mrb[13].mxu1 }
 0x5cd   : > { %v1331_v20 = vadd.f32 %v1330_v19, %v2517_v5  ;;  %v1332_v21 = vpop.f32.mrb[14].mxu1 }
 0x5ce   : > { %v1686_v22 = vmul.f32 -1.442695, %v1329_v18  ;;  %v1333_v23 = vadd.f32 %v1332_v21, %v2514_v4  ;;  %v1334_v24 = vpop.f32.mrb[15].mxu1 }
 0x5cf   : > { %v1687_v25 = vmul.f32 -1.442695, %v1331_v20  ;;  %v1335_v26 = vadd.f32 %v1334_v24, %v2517_v5 }
 0x5d0   : > { %1990 = vpow2.f32 %v1686_v22  ;;  %v1688_v27 = vmul.f32 -1.442695, %v1333_v23 }
 0x5d1   : > { %1992 = vpow2.f32 %v1687_v25  ;;  %v1689_v28 = vmul.f32 -1.442695, %v1335_v26 }
 0x5d2   : > { %v1983_v29 = vpop.eup %1982  ;;  %1994 = vpow2.f32 %v1688_v27 }
 0x5d3   : > { %v1985_v30 = vpop.eup %1984  ;;  %v1405_v31 = vadd.f32 1.0, %v1983_v29  ;;  %1996 = vpow2.f32 %v1689_v28 }
 0x5d4   : > { %v1987_v32 = vpop.eup %1986  ;;  %v1406_v33 = vadd.f32 1.0, %v1985_v30 }
 0x5d5   : > { %v1989_v34 = vpop.eup %1988  ;;  %1998 = vrcp.f32 %v1405_v31  ;;  %v1407_v36 = vadd.f32 1.0, %v1987_v32 }
 0x5d6   : > { %2000 = vrcp.f32 %v1406_v33  ;;  %v1408_v37 = vadd.f32 1.0, %v1989_v34 }
 0x5d7   : > { %2002 = vrcp.f32 %v1407_v36  ;;  %v1338_v39 = vpop.f32.mrb[16].mxu1 }
 0x5d8   : > { %2004 = vrcp.f32 %v1408_v37  ;;  %v1339_v40 = vadd.f32 %v1338_v39, %v2514_v4  ;;  %v1340_v41 = vpop.f32.mrb[17].mxu1 }
 0x5d9   : > { %v1341_v42 = vadd.f32 %v1340_v41, %v2517_v5  ;;  %v1342_v43 = vpop.f32.mrb[18].mxu1 }
 0x5da   : > { %v1991_v44 = vpop.eup %1990  ;;  %v1690_v45 = vmul.f32 -1.442695, %v1339_v40  ;;  %v1343_v46 = vadd.f32 %v1342_v43, %v2514_v4  ;;  %v1344_v47 = vpop.f32.mrb[19].mxu1 }
 0x5db   : > { %v1993_v48 = vpop.eup %1992  ;;  %v1409_v49 = vadd.f32 1.0, %v1991_v44  ;;  %v1345_v35 = vadd.f32 %v1344_v47, %v2517_v5  ;;  %v1691_v54 = vmul.f32 -1.442695, %v1341_v42 }
 0x5dc   : > { %v1995_v50 = vpop.eup %1994  ;;  %v1410_v51 = vadd.f32 1.0, %v1993_v48  ;;  %2006 = vpow2.f32 %v1690_v45  ;;  %v1692_v56 = vmul.f32 -1.442695, %v1343_v46 }
 0x5dd   : > { %v1997_v52 = vpop.eup %1996  ;;  %2008 = vrcp.f32 %v1409_v49  ;;  %v1411_v53 = vadd.f32 1.0, %v1995_v50  ;;  %v1693_v58 = vmul.f32 -1.442695, %v1345_v35 }
 0x5de   : > { %2010 = vrcp.f32 %v1410_v51  ;;  %v1412_v55 = vadd.f32 1.0, %v1997_v52 }
 0x5df   : > { %v1999_v57 = vpop.eup %1998  ;;  %2012 = vrcp.f32 %v1411_v53  ;;  %v1348_v59 = vpop.f32.mrb[20].mxu1 }
 0x5e0   : > { %v2001_v60 = vpop.eup %2000  ;;  %1453 = vst [vmem:[%s2534_s11] sm:$0xff] %v1999_v57  ;;  %2014 = vrcp.f32 %v1412_v55  ;;  %v1349_v61 = vadd.f32 %v1348_v59, %v2514_v4  ;;  %v1350_v62 = vpop.f32.mrb[21].mxu1 }
 0x5e1   : > { %v2003_v63 = vpop.eup %2002  ;;  %1454 = vst [vmem:[%s2534_s11 + $0x8] sm:$0xff] %v2001_v60  ;;  %2016 = vpow2.f32 %v1691_v54  ;;  %v1351_v0 = vadd.f32 %v1350_v62, %v2517_v5  ;;  %v1352_v1 = vpop.f32.mrb[22].mxu1 }
 0x5e2   : > { %v2005_v2 = vpop.eup %2004  ;;  %1455 = vst [vmem:[%s2534_s11 + $0x10] sm:$0xff] %v2003_v63  ;;  %2018 = vpow2.f32 %v1692_v56  ;;  %v1694_v3 = vmul.f32 -1.442695, %v1349_v61  ;;  %v1353_v6 = vadd.f32 %v1352_v1, %v2514_v4  ;;  %v1354_v7 = vpop.f32.mrb[23].mxu1 }
 0x5e3   : > { %1456 = vst [vmem:[%s2534_s11 + $0x18] sm:$0xff] %v2005_v2  ;;  %2020 = vpow2.f32 %v1693_v58  ;;  %v1695_v8 = vmul.f32 -1.442695, %v1351_v0  ;;  %v1355_v9 = vadd.f32 %v1354_v7, %v2517_v5 }
 0x5e4   : > { %2022 = vpow2.f32 %v1694_v3  ;;  %v1696_v11 = vmul.f32 -1.442695, %v1353_v6 }
 0x5e5   : > { %2024 = vpow2.f32 %v1695_v8  ;;  %v1697_v12 = vmul.f32 -1.442695, %v1355_v9 }
 0x5e6   : > { %v2007_v10 = vpop.eup %2006  ;;  %2026 = vpow2.f32 %v1696_v11 }
 0x5e7   : > { %v2009_v13 = vpop.eup %2008  ;;  %v1413_v14 = vadd.f32 1.0, %v2007_v10  ;;  %2028 = vpow2.f32 %v1697_v12 }
 0x5e8   : > { %v2011_v4 = vpop.eup %2010  ;;  %1457 = vst [vmem:[%s2534_s11 + $0x20] sm:$0xff] %v2009_v13 }
 0x5e9   : > { %v2013_v15 = vpop.eup %2012  ;;  %1458 = vst [vmem:[%s2534_s11 + $0x28] sm:$0xff] %v2011_v4  ;;  %2030 = vrcp.f32 %v1413_v14 }
 0x5ea   : > { %v2015_v16 = vpop.eup %2014  ;;  %1459 = vst [vmem:[%s2534_s11 + $0x30] sm:$0xff] %v2013_v15 }
 0x5eb   : > { %v2017_v17 = vpop.eup %2016  ;;  %1460 = vst [vmem:[%s2534_s11 + $0x38] sm:$0xff] %v2015_v16 }
 0x5ec   : > { %v2019_v5 = vpop.eup %2018  ;;  %v1414_v38 = vadd.f32 1.0, %v2017_v17 }
 0x5ed   : > { %v2021_v18 = vpop.eup %2020  ;;  %v1415_v19 = vadd.f32 1.0, %v2019_v5 }
 0x5ee   : > { %v2023_v20 = vpop.eup %2022  ;;  %2032 = vrcp.f32 %v1414_v38  ;;  %v1416_v21 = vadd.f32 1.0, %v2021_v18 }
 0x5ef   : > { %v2025_v22 = vpop.eup %2024  ;;  %2034 = vrcp.f32 %v1415_v19  ;;  %v1417_v23 = vadd.f32 1.0, %v2023_v20 }
 0x5f0   : > { %v2027_v24 = vpop.eup %2026  ;;  %2036 = vrcp.f32 %v1416_v21  ;;  %v1418_v25 = vadd.f32 1.0, %v2025_v22 }
 0x5f1   : > { %v2029_v26 = vpop.eup %2028  ;;  %2038 = vrcp.f32 %v1417_v23  ;;  %v1419_v27 = vadd.f32 1.0, %v2027_v24 }
 0x5f2   : > { %2040 = vrcp.f32 %v1418_v25  ;;  %v1420_v28 = vadd.f32 1.0, %v2029_v26 }
 0x5f3   : > { %v2031_v29 = vpop.eup %2030  ;;  %2042 = vrcp.f32 %v1419_v27 }
 0x5f4   : > { %1461 = vst [vmem:[%s2534_s11 + $0x40] sm:$0xff] %v2031_v29  ;;  %2044 = vrcp.f32 %v1420_v28 }
 0x5f8   : > { %v2033_v30 = vpop.eup %2032 }
 0x5f9   : > { %v2035_v31 = vpop.eup %2034  ;;  %1462 = vst [vmem:[%s2534_s11 + $0x48] sm:$0xff] %v2033_v30 }
 0x5fa   : > { %v2037_v32 = vpop.eup %2036  ;;  %1463 = vst [vmem:[%s2534_s11 + $0x50] sm:$0xff] %v2035_v31 }
 0x5fb   : > { %v2039_v33 = vpop.eup %2038  ;;  %1464 = vst [vmem:[%s2534_s11 + $0x58] sm:$0xff] %v2037_v32 }
 0x5fc   : > { %v2041_v34 = vpop.eup %2040  ;;  %1465 = vst [vmem:[%s2534_s11 + $0x60] sm:$0xff] %v2039_v33 }
 0x5fd   : > { %v2043_v36 = vpop.eup %2042  ;;  %1466 = vst [vmem:[%s2534_s11 + $0x68] sm:$0xff] %v2041_v34 }
 0x5fe   : > { %v2045_v37 = vpop.eup %2044  ;;  %1467 = vst [vmem:[%s2534_s11 + $0x70] sm:$0xff] %v2043_v36 }
 0x5ff   : > { %1468 = vst [vmem:[%s2534_s11 + $0x78] sm:$0xff] %v2045_v37 }
 0x600   : > { %2087 = shalt.err (!%p2084_p7)
}
 0x601   : > { %s2088_s10 = scalar_lea.hbm %s2558_s18, 2048  ;;  %s2092_s16 = scalar_lea.hbm %s2613_s5, 8192 }
 0x602   : > { %p2089_p8 = scmp.ne.s32.totalorder %s2558_s18, %s2088_s10  ;;  %p2093_p1 = scmp.lt.u32.totalorder %s2558_s18, %s2613_s5 }
 0x603   : > { %p2094_p0 = scmp.lt.u32.totalorder %s2092_s16, %s2088_s10  ;;  %p2096_p6 = scmp.lt.u32.totalorder %s2088_s10, %s2558_s18 }
 0x604   : > { %p2090_p11 = pnand %p2089_p8, %p2625_p9 }
 0x605   : > { %p2095_p5 = por %p2094_p0, %p2093_p1 }
 0x606   : > { %p2091_p13 = pneg %p2090_p11 }
 0x607   : > { %p2097_p10 = por %p2096_p6, %p2095_p5 }
 0x609   : > { %p2098_p12 = pnand %p2097_p10, %p2091_p13 }
 0x60b   : > { %2101 = shalt.err (!%p2098_p12)
}
 0x60c   : > { %s2149_s9 = smov 256   ;;  %s2150_s19 = smov 16  }
 0x60d   : > { %1835 = dma.vmem_to_hbm [thread:$0]  (%p2625_p9), %s2560_s17, 2048, %s2558_s18, %s2567_s25, %s2149_s9, %s2149_s9, %s2150_s19  }
 0x60e PF: > { %p1847_p2 = scmp.ge.s32.totalorder %s2140_s24, 2  ;;  %s1508_s20 = sand.u32 1, %s2128_s21  }
 0x60f   : > { %p2626_p3 = scmp.ne.s32.totalorder %s2619_s8, 0  ;;  %s1509_s15 = scalar_lea.sflag [#allocation4], %s1508_s20 }
 0x611   : > { %p1842_p4 = pnand %p1847_p2, %p2626_p3 }
 0x613   : > { %2123 = dma.done.wait (!%p1842_p4), %s1509_s15, 2048  }
 0x614   : > { %2125 = vsyncadd (!%p1842_p4), %s1509_s15, 4294965248  ;;  %p18_p7 = scmp.ge.s32.totalorder %s2211_s27, 6   ;;  %s2627_s21 = smov %s2132_s22 }
 0x615   : > { %s2628_s22 = smov %s2136_s23  ;;  %s2629_s23 = smov %s2222_s30 }
 0x616   : > { %s2630_s24 = smov %s2211_s27  ;;  %20 = sbr.rel (!%p18_p7) target bundleno = 4 (0x4), region = 95 }
 0x61d   :  { %1522 = vsyncpa [#allocation3], 1 }
 0x61e   :  { %1524 = vsyncpa [#allocation3 + $0x1], 1 }
 0x61f   :  { %1525 = vsyncpa [#allocation4], 1 }
 0x620   :  { %1527 = vsyncpa [#allocation4 + $0x1], 1 }

</bundles_post_ra>
